<compile_context>
chip_gen: v5e
topology: v5e:2x2
jax: 0.10.0
libtpu: 0.0.40
codegen_flags: <defaults>
</compile_context>

<pallas_src>
import functools

import jax
import jax.numpy as jnp
from jax.experimental import pallas as pl
from jax.experimental.pallas import tpu as pltpu

H = 50  # hidden width


def _pinn_kernel(x_ref, w1_ref, b1_ref, w2_ref, b2_ref, w3_ref, b3_ref, o_ref,
                 *, act_dtype):
    # x_ref:  (2, tm)   transposed input tile (batch on lanes)
    # w1_ref: (50, 2)   torch layout (out_features, in_features)
    # b1_ref: (50, 1)
    # w2_ref: (50, 50)  torch layout (out, in)
    # b2_ref: (50, 1)
    # w3_ref: (50, 2)   transposed torch layout (in, out)
    # b3_ref: (2, 1)
    # o_ref:  (2, tm)
    x = x_ref[...]
    w1 = w1_ref[...]

    # --- Layer 1: contraction dim is only 2 -> broadcast-FMA on the VPU,
    #     instead of a >98%-padded MXU pass.
    h1_pre = (w1[:, 0:1] * x[0:1, :] + w1[:, 1:2] * x[1:2, :]) + b1_ref[...]  # (50, tm)
    h1 = jnp.tanh(h1_pre.astype(act_dtype))

    # --- Layer 2: the only real matmul (50x50) -> MXU, f32 accumulation.
    h2_pre = jnp.dot(w2_ref[...].astype(act_dtype), h1,
                     preferred_element_type=jnp.float32) + b2_ref[...]        # (50, tm)
    h2 = jnp.tanh(h2_pre.astype(act_dtype))

    # --- Layer 3: only 2 output rows -> VPU multiply + sublane reduction (XLU).
    h2f = h2.astype(jnp.float32)
    w3 = w3_ref[...]                                                          # (50, 2)
    y0 = jnp.sum(w3[:, 0:1] * h2f, axis=0, keepdims=True)                     # (1, tm)
    y1 = jnp.sum(w3[:, 1:2] * h2f, axis=0, keepdims=True)                     # (1, tm)
    y = jnp.concatenate([y0, y1], axis=0) + b3_ref[...]                       # (2, tm)
    o_ref[...] = y.astype(o_ref.dtype)


def pinn_forward(x, params, *, tm=1024, act_dtype=jnp.float32):
    """x: (N, 2) float32; params in torch layout (see init_params).

    tm: batch tile (lane dim) -- sweep 1024..4096 on real collocation counts.
    act_dtype: jnp.bfloat16 is an option on v6e/v7x only (EUP/VPU have bf16);
               keep jnp.float32 on v5e and whenever PINN residual accuracy
               (high-order derivatives) matters.
    """
    n, d_in = x.shape
    assert d_in == 2

    w1, b1 = params["w1"], params["b1"]   # (50, 2), (50, 1)
    w2, b2 = params["w2"], params["b2"]   # (50, 50), (50, 1)
    w3, b3 = params["w3"], params["b3"]   # (2, 50), (2, 1)
    w3_t = w3.T                           # (50, 2): kernel slices 2-D columns

    # Batch sits on the lane axis, so the tile must be a multiple of 128.
    # Cap it at the 128-rounded batch so tiny batches use one small tile.
    # (v7x note: for huge N prefer a tm that leaves grid length >= ~4-8 steps
    # so the "parallel" axis can shard across both TensorCores.)
    tm_eff = min(tm, pl.cdiv(n, 128) * 128)
    n_pad = pl.cdiv(n, tm_eff) * tm_eff

    # Transpose to feature-major; the ragged-tail pad rides along in the same
    # fused layout op (no standalone full-array pad copy).
    x_t = x.T
    if n_pad != n:
        x_t = jnp.pad(x_t, ((0, 0), (0, n_pad - n)))

    grid = (n_pad // tm_eff,)

    n_params = 2 * H + H + H * H + H + 2 * H + 2
    cost = pl.CostEstimate(
        flops=2 * n_pad * (2 * H + H * H + H * 2),
        transcendentals=2 * H * n_pad,
        bytes_accessed=4 * (4 * n_pad + n_params),
    )

    out_t = pl.pallas_call(
        functools.partial(_pinn_kernel, act_dtype=act_dtype),
        out_shape=jax.ShapeDtypeStruct((2, n_pad), x.dtype),
        grid_spec=pltpu.PrefetchScalarGridSpec(
            num_scalar_prefetch=0,
            grid=grid,
            in_specs=[
                pl.BlockSpec((2, tm_eff), lambda i: (0, i)),   # x^T tile
                pl.BlockSpec((H, 2), lambda i: (0, 0)),        # w1
                pl.BlockSpec((H, 1), lambda i: (0, 0)),        # b1
                pl.BlockSpec((H, H), lambda i: (0, 0)),        # w2
                pl.BlockSpec((H, 1), lambda i: (0, 0)),        # b2
                pl.BlockSpec((H, 2), lambda i: (0, 0)),        # w3^T
                pl.BlockSpec((2, 1), lambda i: (0, 0)),        # b3
            ],
            out_specs=pl.BlockSpec((2, tm_eff), lambda i: (0, i)),
        ),
        compiler_params=pltpu.CompilerParams(
            dimension_semantics=("parallel",),
        ),
        cost_estimate=cost,
    )(x_t, w1, b1, w2, b2, w3_t, b3)

    # TODO(synk): add a custom_vjp (or a pure-JAX grad path) -- autodiff does
    # not flow through pallas_call, and PINN training needs d(out)/d(x, params).
    return out_t.T[:n]


def init_params(key):
    """Deterministic init mimicking nn.Linear uniform(-1/sqrt(fan_in), +)."""
    ks = jax.random.split(key, 6)

    def lin(kw, kb, fan_in, fan_out):
        bound = 1.0 / jnp.sqrt(float(fan_in))
        w = jax.random.uniform(kw, (fan_out, fan_in), jnp.float32, -bound, bound)
        b = jax.random.uniform(kb, (fan_out, 1), jnp.float32, -bound, bound)
        return w, b

    w1, b1 = lin(ks[0], ks[1], 2, H)
    w2, b2 = lin(ks[2], ks[3], H, H)
    w3, b3 = lin(ks[4], ks[5], H, 2)
    return {"w1": w1, "b1": b1, "w2": w2, "b2": b2, "w3": w3, "b3": b3}


def pinn_forward_ref(x, p):
    h1 = jnp.tanh(x @ p["w1"].T + p["b1"][:, 0])
    h2 = jnp.tanh(h1 @ p["w2"].T + p["b2"][:, 0])
    return h2 @ p["w3"].T + p["b3"][:, 0]


if __name__ == "__main__":
    key = jax.random.PRNGKey(0)
    k_param, k_x = jax.random.split(key)

    params = init_params(k_param)
    x = jax.random.normal(k_x, (8, 2), jnp.float32)   # small batch of (t, x) points

    out = pinn_forward(x, params)
    out = jax.block_until_ready(out)

    ref = pinn_forward_ref(x, params)
    assert out.shape == (8, 2), out.shape
    assert jnp.allclose(out, ref, atol=1e-5, rtol=1e-5), "mismatch vs reference"

    print("KERNEL_OK")
</pallas_src>

<mosaic_0001>
module attributes {stable_mosaic.version = 11 : i64} {
  func.func @_pinn_kernel(%arg0: i32, %arg1: memref<2x128xf32, #tpu.memory_space<vmem>>, %arg2: memref<50x2xf32, #tpu.memory_space<vmem>>, %arg3: memref<50x1xf32, #tpu.memory_space<vmem>>, %arg4: memref<50x50xf32, #tpu.memory_space<vmem>>, %arg5: memref<50x1xf32, #tpu.memory_space<vmem>>, %arg6: memref<50x2xf32, #tpu.memory_space<vmem>>, %arg7: memref<2x1xf32, #tpu.memory_space<vmem>>, %arg8: memref<2x128xf32, #tpu.memory_space<vmem>>) attributes {dimension_semantics = [#tpu.dimension_semantics<parallel>], iteration_bounds = array<i64: 1>, scalar_prefetch = 0 : i64, scratch_operands = 0 : i64, tpu.core_type = #tpu.core_type<tc>, window_params = [{transform_indices = @transform_0, window_bounds = array<i64: 2, 128>}, {pipeline_mode = #tpu.pipeline_mode<synchronous>, transform_indices = @transform_1, window_bounds = array<i64: 50, 2>}, {pipeline_mode = #tpu.pipeline_mode<synchronous>, transform_indices = @transform_2, window_bounds = array<i64: 50, 1>}, {pipeline_mode = #tpu.pipeline_mode<synchronous>, transform_indices = @transform_3, window_bounds = array<i64: 50, 50>}, {pipeline_mode = #tpu.pipeline_mode<synchronous>, transform_indices = @transform_4, window_bounds = array<i64: 50, 1>}, {pipeline_mode = #tpu.pipeline_mode<synchronous>, transform_indices = @transform_5, window_bounds = array<i64: 50, 2>}, {pipeline_mode = #tpu.pipeline_mode<synchronous>, transform_indices = @transform_6, window_bounds = array<i64: 2, 1>}, {transform_indices = @transform_7, window_bounds = array<i64: 2, 128>}]} {
    %c0 = arith.constant 0 : index
    %c0_0 = arith.constant 0 : index
    %0 = vector.load %arg1[%c0, %c0_0] : memref<2x128xf32, #tpu.memory_space<vmem>>, vector<2x128xf32>
    %c0_1 = arith.constant 0 : index
    %c0_2 = arith.constant 0 : index
    %1 = vector.load %arg2[%c0_1, %c0_2] : memref<50x2xf32, #tpu.memory_space<vmem>>, vector<50x2xf32>
    %2 = vector.extract_strided_slice %1 {offsets = [0, 0], sizes = [50, 1], strides = [1, 1]} : vector<50x2xf32> to vector<50x1xf32>
    %3 = vector.extract_strided_slice %0 {offsets = [0, 0], sizes = [1, 128], strides = [1, 1]} : vector<2x128xf32> to vector<1x128xf32>
    %4 = vector.broadcast %2 : vector<50x1xf32> to vector<50x128xf32>
    %5 = vector.broadcast %3 : vector<1x128xf32> to vector<50x128xf32>
    %6 = arith.mulf %4, %5 : vector<50x128xf32>
    %7 = vector.extract_strided_slice %1 {offsets = [0, 1], sizes = [50, 1], strides = [1, 1]} : vector<50x2xf32> to vector<50x1xf32>
    %8 = vector.extract_strided_slice %0 {offsets = [1, 0], sizes = [1, 128], strides = [1, 1]} : vector<2x128xf32> to vector<1x128xf32>
    %9 = vector.broadcast %7 : vector<50x1xf32> to vector<50x128xf32>
    %10 = vector.broadcast %8 : vector<1x128xf32> to vector<50x128xf32>
    %11 = arith.mulf %9, %10 : vector<50x128xf32>
    %12 = arith.addf %6, %11 : vector<50x128xf32>
    %c0_3 = arith.constant 0 : index
    %c0_4 = arith.constant 0 : index
    %13 = vector.load %arg3[%c0_3, %c0_4] : memref<50x1xf32, #tpu.memory_space<vmem>>, vector<50x1xf32>
    %14 = vector.broadcast %13 : vector<50x1xf32> to vector<50x128xf32>
    %15 = arith.addf %12, %14 : vector<50x128xf32>
    %16 = math.tanh %15 : vector<50x128xf32>
    %c0_5 = arith.constant 0 : index
    %c0_6 = arith.constant 0 : index
    %17 = vector.load %arg4[%c0_5, %c0_6] : memref<50x50xf32, #tpu.memory_space<vmem>>, vector<50x50xf32>
    %cst = arith.constant dense<0.000000e+00> : vector<50x128xf32>
    %18 = tpu.matmul %17, %16, %cst {dimension_numbers = #tpu.dot_dimension_numbers<[1], [0], [0], [1], [0, 0, 1, 1], [], []>} : vector<50x50xf32>, vector<50x128xf32>, vector<50x128xf32> -> vector<50x128xf32>
    %c0_7 = arith.constant 0 : index
    %c0_8 = arith.constant 0 : index
    %19 = vector.load %arg5[%c0_7, %c0_8] : memref<50x1xf32, #tpu.memory_space<vmem>>, vector<50x1xf32>
    %20 = vector.broadcast %19 : vector<50x1xf32> to vector<50x128xf32>
    %21 = arith.addf %18, %20 : vector<50x128xf32>
    %22 = math.tanh %21 : vector<50x128xf32>
    %c0_9 = arith.constant 0 : index
    %c0_10 = arith.constant 0 : index
    %23 = vector.load %arg6[%c0_9, %c0_10] : memref<50x2xf32, #tpu.memory_space<vmem>>, vector<50x2xf32>
    %24 = vector.extract_strided_slice %23 {offsets = [0, 0], sizes = [50, 1], strides = [1, 1]} : vector<50x2xf32> to vector<50x1xf32>
    %25 = vector.broadcast %24 : vector<50x1xf32> to vector<50x128xf32>
    %26 = arith.mulf %25, %22 : vector<50x128xf32>
    %cst_11 = arith.constant dense<0.000000e+00> : vector<128xf32>
    %27 = vector.multi_reduction <add>, %26, %cst_11 [0] : vector<50x128xf32> to vector<128xf32>
    %28 = vector.shape_cast %27 : vector<128xf32> to vector<1x128xf32>
    %29 = vector.extract_strided_slice %23 {offsets = [0, 1], sizes = [50, 1], strides = [1, 1]} : vector<50x2xf32> to vector<50x1xf32>
    %30 = vector.broadcast %29 : vector<50x1xf32> to vector<50x128xf32>
    %31 = arith.mulf %30, %22 : vector<50x128xf32>
    %cst_12 = arith.constant dense<0.000000e+00> : vector<128xf32>
    %32 = vector.multi_reduction <add>, %31, %cst_12 [0] : vector<50x128xf32> to vector<128xf32>
    %33 = vector.shape_cast %32 : vector<128xf32> to vector<1x128xf32>
    %34 = tpu.concatenate %28, %33 in 0 : vector<1x128xf32>, vector<1x128xf32> -> vector<2x128xf32>
    %c0_13 = arith.constant 0 : index
    %c0_14 = arith.constant 0 : index
    %35 = vector.load %arg7[%c0_13, %c0_14] : memref<2x1xf32, #tpu.memory_space<vmem>>, vector<2x1xf32>
    %36 = vector.broadcast %35 : vector<2x1xf32> to vector<2x128xf32>
    %37 = arith.addf %34, %36 : vector<2x128xf32>
    %c0_15 = arith.constant 0 : index
    %c0_16 = arith.constant 0 : index
    %38 = vector.load %arg8[%c0_15, %c0_16] : memref<2x128xf32, #tpu.memory_space<vmem>>, vector<2x128xf32>
    tpu.vector_store %arg8[%c0_15, %c0_16], %37 {strides = array<i32>} : memref<2x128xf32, #tpu.memory_space<vmem>>, vector<2x128xf32>,
    return
  }
  func.func @transform_0(%arg0: i32) -> (i32, i32) {
    %c0_i32 = arith.constant 0 : i32
    %c0_i32_0 = arith.constant 0 : i32
    return %c0_i32, %arg0 : i32, i32
  }
  func.func @transform_1(%arg0: i32) -> (i32, i32) {
    %c0_i32 = arith.constant 0 : i32
    %c0_i32_0 = arith.constant 0 : i32
    %c0_i32_1 = arith.constant 0 : i32
    return %c0_i32, %c0_i32_0 : i32, i32
  }
  func.func @transform_2(%arg0: i32) -> (i32, i32) {
    %c0_i32 = arith.constant 0 : i32
    %c0_i32_0 = arith.constant 0 : i32
    %c0_i32_1 = arith.constant 0 : i32
    return %c0_i32, %c0_i32_0 : i32, i32
  }
  func.func @transform_3(%arg0: i32) -> (i32, i32) {
    %c0_i32 = arith.constant 0 : i32
    %c0_i32_0 = arith.constant 0 : i32
    %c0_i32_1 = arith.constant 0 : i32
    return %c0_i32, %c0_i32_0 : i32, i32
  }
  func.func @transform_4(%arg0: i32) -> (i32, i32) {
    %c0_i32 = arith.constant 0 : i32
    %c0_i32_0 = arith.constant 0 : i32
    %c0_i32_1 = arith.constant 0 : i32
    return %c0_i32, %c0_i32_0 : i32, i32
  }
  func.func @transform_5(%arg0: i32) -> (i32, i32) {
    %c0_i32 = arith.constant 0 : i32
    %c0_i32_0 = arith.constant 0 : i32
    %c0_i32_1 = arith.constant 0 : i32
    return %c0_i32, %c0_i32_0 : i32, i32
  }
  func.func @transform_6(%arg0: i32) -> (i32, i32) {
    %c0_i32 = arith.constant 0 : i32
    %c0_i32_0 = arith.constant 0 : i32
    %c0_i32_1 = arith.constant 0 : i32
    return %c0_i32, %c0_i32_0 : i32, i32
  }
  func.func @transform_7(%arg0: i32) -> (i32, i32) {
    %c0_i32 = arith.constant 0 : i32
    %c0_i32_0 = arith.constant 0 : i32
    return %c0_i32, %arg0 : i32, i32
  }
}

</mosaic_0001>

<bundles_post_ra>
// kernel: tpu_custom_call.1
= control target key start
LH: loop header
LB: loop body
LE: loop exit
PB: predicated region body
PF: predicated region fallthrough
CT: control target
= control target key end

     0   :  { %v538_v3 = vmov 1   ;;  %v539_v4 = vmov 0   ;;  %s748_s0 = inlined_call_operand.vmem [shape: f32[2,128], index: 0, kind: input, shape index: {}]   ;;  %s749_s1 = inlined_call_operand.vmem [shape: f32[50,2], index: 1, kind: input, shape index: {}]   ;;  %s750_s2 = inlined_call_operand.vmem [shape: f32[50,1], index: 2, kind: input, shape index: {}]   ;;  %s751_s3 = inlined_call_operand.vmem [shape: f32[50,50], index: 3, kind: input, shape index: {}]   ;;  %s752_s4 = inlined_call_operand.vmem [shape: f32[50,1], index: 4, kind: input, shape index: {}]   ;;  %s753_s5 = inlined_call_operand.vmem [shape: f32[50,2], index: 5, kind: input, shape index: {}]   ;;  %s754_s6 = inlined_call_operand.vmem [shape: f32[2,1], index: 6, kind: input, shape index: {}]   ;;  %s755_s7 = inlined_call_operand.hbm [shape: f32[2,128], index: 7, kind: output, shape index: {}]  }
   0x1   :  { %v34_v0 = vld [vmem:[%s749_s1 + $0x30] sm:$0x3]  ;;  %v32_v1 = vld [vmem:[%s749_s1 + $0x20] sm:$0xff]  ;;  %470 = vset.pattern.permute.xlu0 %v538_v3  ;;  %466 = vset.pattern.permute.xlu2 %v539_v4 }
   0x2   :  { %v30_v2 = vld [vmem:[%s749_s1 + $0x10] sm:$0xff]  ;;  %465 = vset.pattern.permute.xlu1 %v539_v4  ;;  %67 = vperm.xlu2 %466, %v34_v0  }
   0x3   :  { %95 = vperm.xlu0 %470, %v32_v1   ;;  %47 = vperm.xlu1 %465, %v30_v2  }
   0x4   :  { %12 = vsyncpa [#allocation3], 0  ;;  %v31_v5 = vld [vmem:[%s749_s1 + $0x18] sm:$0xff]  ;;  %v28_v6 = vld [vmem:[%s749_s1] sm:$0xff]  ;;  %vm248_vm0 = vcmask 1041408   ;;  %vm226_vm1 = vcmask 408576  }
   0x5   :  { %v33_v7 = vld [vmem:[%s749_s1 + $0x28] sm:$0xff]  ;;  %v127_v9 = vld [vmem:[%s750_s2 + $0x30] sm:$0x3]  ;;  %v125_v10 = vld [vmem:[%s750_s2 + $0x20] sm:$0xff]  ;;  %vm407_vm2 = vcmask 1040384   ;;  %s424_s23 = sshll.u32 %s755_s7, 4  ;;  %s425_s23 = int_to_ptr.hbm [resolvable:$true] %s424_s23 }
   0x6   :  { %v29_v8 = vld [vmem:[%s749_s1 + $0x8] sm:$0xff]  ;;  %v124_v13 = vld [vmem:[%s750_s2 + $0x18] sm:$0xff]  ;;  %v123_v15 = vld [vmem:[%s750_s2 + $0x10] sm:$0xff] }
   0x7   :  { %v126_v11 = vld [vmem:[%s750_s2 + $0x28] sm:$0xff]  ;;  %v188_v16 = vld [vmem:[%s752_s4 + $0x20] sm:$0xff]  ;;  %v187_v20 = vld [vmem:[%s752_s4 + $0x18] sm:$0xff] }
   0x8   :  { %v122_v12 = vld [vmem:[%s750_s2 + $0x8] sm:$0xff]  ;;  %v184_v17 = vld [vmem:[%s752_s4] sm:$0xff]  ;;  %v186_v21 = vld [vmem:[%s752_s4 + $0x10] sm:$0xff] }
   0x9   :  { %v185_v14 = vld [vmem:[%s752_s4 + $0x8] sm:$0xff]  ;;  %v121_v18 = vld [vmem:[%s750_s2] sm:$0xff]  ;;  %v300_v22 = vld [vmem:[%s753_s5 + $0x18] sm:$0xff] }
   0xa   :  { %467 = vset.pattern.permute.xlu2 %v538_v3  ;;  %v297_v19 = vld [vmem:[%s753_s5] sm:$0xff]  ;;  %v190_v23 = vld [vmem:[%s752_s4 + $0x30] sm:$0x3]  ;;  %v189_v24 = vld [vmem:[%s752_s4 + $0x28] sm:$0xff] }
   0xb   :  { %471 = vset.pattern.permute.xlu0 %v539_v4  ;;  %52 = vperm.xlu1 %465, %v31_v5   ;;  %v299_v25 = vld [vmem:[%s753_s5 + $0x10] sm:$0xff]  ;;  %v298_v26 = vld [vmem:[%s753_s5 + $0x8] sm:$0xff]  ;;  %v27_v35 = vld [vmem:[%s748_s0] sm:$0x3] }
   0xc   :  { %103 = vperm.xlu2 %467, %v34_v0   ;;  %37 = vperm.xlu0 %471, %v28_v6   ;;  %v677_v38 = vperm.slane %v27_v35, 1  ;;  %v679_v40 = vperm.slane %v27_v35, 0 }
  0x13   :  { %468 = vset.pattern.permute.xlu1 %v538_v3 }
  0x14   :  { %469 = vset.pattern.permute.xlu2 %v539_v4  ;;  %99 = vperm.xlu1 %468, %v33_v7  }
  0x15   :  { %42 = vperm.xlu0 %471, %v29_v8   ;;  %57 = vperm.xlu2 %469, %v32_v1  }
  0x1c   :  { %472 = vset.pattern.permute.xlu1 %v539_v4 }
  0x1d   :  { %62 = vperm.xlu0 %471, %v33_v7   ;;  %473 = vset.pattern.permute.xlu2 %v538_v3 }
  0x1e   :  { %160 = vperm.xlu1 %472, %v127_v9   ;;  %91 = vperm.xlu2 %473, %v31_v5  }
  0x25   :  { %150 = vperm.xlu0 %471, %v125_v10  }
  0x26   :  { %155 = vperm.xlu1 %472, %v126_v11   ;;  %87 = vperm.xlu2 %473, %v30_v2  }
  0x2d   :  { %135 = vperm.xlu0 %471, %v122_v12  }
  0x2e   :  { %474 = vset.pattern.permute.xlu1 %v538_v3  ;;  %475 = vset.pattern.permute.xlu2 %v539_v4 }
  0x2f   :  { %83 = vperm.xlu1 %474, %v29_v8   ;;  %145 = vperm.xlu2 %475, %v124_v13  }
  0x35   :  { %198 = vperm.xlu0 %471, %v185_v14  }
  0x37   :  { %79 = vperm.xlu1 %474, %v28_v6   ;;  %140 = vperm.xlu2 %475, %v123_v15  }
  0x3d   :  { %213 = vperm.xlu0 %471, %v188_v16   ;;  %v301_v16 = vld [vmem:[%s753_s5 + $0x20] sm:$0xff] }
  0x3f   :  { %476 = vset.pattern.permute.xlu1 %v539_v4  ;;  %193 = vperm.xlu2 %475, %v184_v17  }
  0x40   :  { %130 = vperm.xlu1 %476, %v121_v18   ;;  %v302_v18 = vld [vmem:[%s753_s5 + $0x28] sm:$0xff] }
  0x45   :  { %306 = vperm.xlu0 %471, %v297_v19  }
  0x47   :  { %208 = vperm.xlu2 %475, %v187_v20  }
  0x48   :  { %203 = vperm.xlu1 %476, %v186_v21  }
  0x4d   :  { %321 = vperm.xlu0 %471, %v300_v22  }
  0x4f   :  { %223 = vperm.xlu2 %475, %v190_v23  }
  0x50   :  { %218 = vperm.xlu1 %476, %v189_v24   ;;  %v409_v24 = vld [vmem:[%s754_s6] sm:$0x3] }
  0x55   :  { %479 = vset.pattern.permute.xlu0 %v538_v3 }
  0x56   :  { %368 = vperm.xlu0 %479, %v299_v25  }
  0x57   :  { %316 = vperm.xlu2 %475, %v299_v25  }
  0x58   :  { %311 = vperm.xlu1 %476, %v298_v26  }
  0x5c   :  { %v68_v27 = vpop.permute.xlu2 %67 }
  0x5d   :  { %v77_v41 = vmul.f32 %v679_v40, %v68_v27 }
  0x5e   :  { %380 = vperm.xlu0 %479, %v302_v18  }
  0x5f   :  { %478 = vset.pattern.permute.xlu2 %v538_v3 }
  0x60   :  { %477 = vset.pattern.permute.xlu1 %v538_v3  ;;  %364 = vperm.xlu2 %478, %v298_v26  }
  0x61   :  { %360 = vperm.xlu1 %477, %v297_v19  }
  0x66   :  { %v104_v28 = vpop.permute.xlu2 %103  ;;  %483 = vset.pattern.permute.xlu0 %v539_v4 }
  0x67   :  { %v113_v42 = vmul.f32 %v677_v38, %v104_v28  ;;  %412 = vperm.xlu0 %483, %v409_v24   ;;  %v177_v28 = vld [vmem:[%s751_s3] sm:$0xff] }
  0x68   :  { %480 = vset.pattern.permute.xlu2 %v539_v4 }
  0x69   :  { %372 = vperm.xlu1 %477, %v300_v22   ;;  %v120_v44 = vadd.f32 %v113_v42, %v77_v41  ;;  %326 = vperm.xlu2 %480, %v301_v16   ;;  %v303_v22 = vld [vmem:[%s753_s5 + $0x30] sm:$0x3] }
  0x6f   :  { %v58_v29 = vpop.permute.xlu2 %57 }
  0x70   :  { %v75_v48 = vmul.f32 %v679_v40, %v58_v29  ;;  %v178_v29 = vld [vmem:[%s751_s3 + $0x8] sm:$0xff] }
  0x71   :  { %376 = vperm.xlu1 %477, %v301_v16   ;;  %331 = vperm.xlu2 %480, %v302_v18  }
  0x75   :  { %v48_v30 = vpop.permute.xlu1 %47  ;;  %v96_v31 = vpop.permute.xlu0 %95 }
  0x76   :  { %v111_v49 = vmul.f32 %v677_v38, %v96_v31  ;;  %v73_v60 = vmul.f32 %v679_v40, %v48_v30  ;;  %v179_v30 = vld [vmem:[%s751_s3 + $0x10] sm:$0xff]  ;;  %v181_v31 = vld [vmem:[%s751_s3 + $0x20] sm:$0xff] }
  0x78   :  { %v92_v32 = vpop.permute.xlu2 %91  ;;  %v118_v56 = vadd.f32 %v111_v49, %v75_v48 }
  0x79   :  { %v110_v51 = vmul.f32 %v677_v38, %v92_v32  ;;  %481 = vset.pattern.permute.xlu1 %v539_v4  ;;  %482 = vset.pattern.permute.xlu2 %v538_v3  ;;  %v180_v4 = vld [vmem:[%s751_s3 + $0x18] sm:$0xff]  ;;  %v182_v3 = vld [vmem:[%s751_s3 + $0x28] sm:$0xff]  ;;  %v183_v32 = vld [vmem:[%s751_s3 + $0x30] sm:$0x3]  ;;  %s540_s3 = smov [#allocation2]  }
  0x7a   :  { %336 = vperm.xlu1 %481, %v303_v22   ;;  %384 = vperm.xlu2 %482, %v303_v22   ;;  %s422_s20 = sshll.u32 %s540_s3, 4  ;;  %s423_s20 = int_to_ptr.vmem [resolvable:$true] %s422_s20 }
  0x7d   :  { %v53_v33 = vpop.permute.xlu1 %52 }
  0x7e   :  { %v672_v34 = vpop.permute.xlu0 %37  ;;  %v74_v52 = vmul.f32 %v679_v40, %v53_v33 }
  0x7f   :  { %v71_v21 = vmul.f32 %v679_v40, %v672_v34 }
  0x80   :  { %v88_v36 = vpop.permute.xlu2 %87  ;;  %v117_v61 = vadd.f32 %v110_v51, %v74_v52 }
  0x81   :  { %v109_v54 = vmul.f32 %v677_v38, %v88_v36 }
  0x83   :  { %v116_v2 = vadd.f32 %v109_v54, %v73_v60 }
  0x86   :  { %v100_v37 = vpop.permute.xlu1 %99 }
  0x87   :  { %v43_v39 = vpop.permute.xlu0 %42  ;;  %v112_v53 = vmul.f32 %v677_v38, %v100_v37 }
  0x88   :  { %v72_v8 = vmul.f32 %v679_v40, %v43_v39 }
  0x89   :  { %v146_v45 = vpop.permute.xlu2 %145 }
  0x8a   :  { %v166_v1 = vadd.f32 %v146_v45, %v117_v61 }
  0x8f   :  { %v63_v43 = vpop.permute.xlu0 %62 }
  0x90   :  { %v161_v46 = vpop.permute.xlu1 %160  ;;  %v76_v50 = vmul.f32 %v679_v40, %v63_v43 }
  0x91   :  { %v169_v47 = vadd.f32 %v161_v46, %v120_v44  ;;  %v141_v0 = vpop.permute.xlu2 %140 }
  0x92   :  { %v119_v57 = vadd.f32 %v112_v53, %v76_v50  ;;  %v165_v5 = vadd.f32 %v141_v0, %v116_v2 }
  0x93   :  { %484 = vtanh.f32 %v169_v47 }
  0x97   :  { %v151_v55 = vpop.permute.xlu0 %150 }
  0x98   :  { %v156_v58 = vpop.permute.xlu1 %155  ;;  %v167_v62 = vadd.f32 %v151_v55, %v118_v56 }
  0x99   :  { %v485_v59 = vpop.eup %484  ;;  %v168_v63 = vadd.f32 %v156_v58, %v119_v57  ;;  %v194_v33 = vpop.permute.xlu2 %193 }
  0x9a   :  { %433 = vmatpush.msk.msra.mxu0 %vm248_vm0, %v485_v59  ;;  %441 = vmatpush.msk.msra.mxu1 %vm248_vm0, %v485_v59 }
  0x9b   :  { %486 = vtanh.f32 %v168_v63  ;;  %442 = vmatpush.msk.msra.mxu2 %vm248_vm0, %v485_v59  ;;  %443 = vmatpush.msk.msra.mxu3 %vm248_vm0, %v485_v59 }
  0x9c   :  { %488 = vtanh.f32 %v167_v62 }
  0x9d   :  { %490 = vtanh.f32 %v166_v1 }
  0x9e   :  { %492 = vtanh.f32 %v165_v5 }
  0x9f   :  { %v136_v13 = vpop.permute.xlu0 %135 }
  0xa1   :  { %v487_v6 = vpop.eup %486  ;;  %v84_v7 = vpop.permute.xlu1 %83 }
  0xa2   :  { %v108_v9 = vmul.f32 %v677_v38, %v84_v7  ;;  %262 = vmatpush.msra.mxu0 %v487_v6  ;;  %444 = vmatpush.msra.mxu1 %v487_v6  ;;  %v489_v10 = vpop.eup %488  ;;  %v209_v35 = vpop.permute.xlu2 %208 }
  0xa3   :  { %445 = vmatpush.msra.mxu2 %v487_v6  ;;  %446 = vmatpush.msra.mxu3 %v487_v6  ;;  %v491_v12 = vpop.eup %490 }
  0xa4   :  { %v115_v11 = vadd.f32 %v108_v9, %v72_v8  ;;  %263 = vmatpush.msra.mxu0 %v489_v10  ;;  %447 = vmatpush.msra.mxu1 %v489_v10  ;;  %v493_v15 = vpop.eup %492 }
  0xa5   :  { %448 = vmatpush.msra.mxu2 %v489_v10  ;;  %449 = vmatpush.msra.mxu3 %v489_v10 }
  0xa6   :  { %v164_v14 = vadd.f32 %v136_v13, %v115_v11  ;;  %264 = vmatpush.msra.mxu0 %v491_v12  ;;  %450 = vmatpush.msra.mxu1 %v491_v12 }
  0xa7   :  { %451 = vmatpush.msra.mxu2 %v491_v12  ;;  %452 = vmatpush.msra.mxu3 %v491_v12  ;;  %v199_v37 = vpop.permute.xlu0 %198 }
  0xa8   :  { %494 = vtanh.f32 %v164_v14  ;;  %265 = vmatpush.msra.mxu0 %v493_v15  ;;  %453 = vmatpush.msra.mxu1 %v493_v15 }
  0xa9   :  { %454 = vmatpush.msra.mxu2 %v493_v15  ;;  %455 = vmatpush.msra.mxu3 %v493_v15  ;;  %v80_v17 = vpop.permute.xlu1 %79 }
  0xaa   :  { %v107_v19 = vmul.f32 %v677_v38, %v80_v17  ;;  %v224_v38 = vpop.permute.xlu2 %223 }
  0xac   :  { %v114_v23 = vadd.f32 %v107_v19, %v71_v21 }
  0xae   :  { %v495_v20 = vpop.eup %494 }
  0xaf   :  { %266 = vmatpush.msra.mxu0 %v495_v20  ;;  %456 = vmatpush.msra.mxu1 %v495_v20  ;;  %v214_v40 = vpop.permute.xlu0 %213 }
  0xb0   :  { %457 = vmatpush.msra.mxu2 %v495_v20  ;;  %458 = vmatpush.msra.mxu3 %v495_v20 }
  0xb2   :  { %v131_v25 = vpop.permute.xlu1 %130  ;;  %v317_v41 = vpop.permute.xlu2 %316 }
  0xb3   :  { %v163_v26 = vadd.f32 %v131_v25, %v114_v23 }
  0xb5   :  { %496 = vtanh.f32 %v163_v26 }
  0xb7   :  { %v307_v44 = vpop.permute.xlu0 %306 }
  0xba   :  { %v204_v34 = vpop.permute.xlu1 %203  ;;  %v365_v43 = vpop.permute.xlu2 %364 }
  0xbb   :  { %v497_v27 = vpop.eup %496 }
  0xbc   :  { %267 = vmatpush.msra.mxu0 %v497_v27  ;;  %459 = vmatpush.msra.mxu1 %v497_v27 }
  0xbd   :  { %460 = vmatpush.msra.mxu2 %v497_v27  ;;  %461 = vmatpush.msra.mxu3 %v497_v27 }
  0xbe   :  { %434 = vmatmul.msk.f32.vlgmr.msra.gmra.mxu0 %vm226_vm1, %v177_v28  ;;  %435 = vmatmul.msk.f32.vlgmr.msra.gmra.mxu1 %vm226_vm1, %v178_v29 }
  0xbf   :  { %437 = vmatmul.msk.f32.vlgmr.msra.gmra.mxu2 %vm226_vm1, %v180_v4  ;;  %439 = vmatmul.msk.f32.vlgmr.msra.gmra.mxu3 %vm226_vm1, %v182_v3  ;;  %v322_v51 = vpop.permute.xlu0 %321 }
  0xc2   :  { %v219_v36 = vpop.permute.xlu1 %218 }
  0xc3   :  { %v327_v50 = vpop.permute.xlu2 %326 }
  0xc6   :  { %436 = vmatmul.msk.f32.gmra.mxu1 %vm226_vm1, %v179_v30 }
  0xc7   :  { %438 = vmatmul.msk.f32.gmra.mxu2 %vm226_vm1, %v181_v31  ;;  %440 = vmatmul.msk.f32.gmra.mxu3 %vm226_vm1, %v183_v32 }
  0xc8   :  { %v369_v63 = vpop.permute.xlu0 %368 }
  0xca   :  { %v312_v39 = vpop.permute.xlu1 %311 }
  0xcb   :  { %v332_v0 = vpop.permute.xlu2 %331 }
  0xd0   :  { %v381_v23 = vpop.permute.xlu0 %380 }
  0xd3   :  { %v361_v42 = vpop.permute.xlu1 %360 }
  0xd4   :  { %v385_v20 = vpop.permute.xlu2 %384 }
  0xdb   :  { %v373_v49 = vpop.permute.xlu1 %372 }
  0xe3   :  { %v377_v59 = vpop.permute.xlu1 %376 }
  0xec   :  { %v337_v21 = vpop.permute.xlu1 %336 }
 0x13b   :  { %v269_v45 = vpop.f32.mrf.mxu0  ;;  %v272_v46 = vpop.f32.mrf.mxu1 }
 0x13c   :  { %v270_v47 = vadd.f32 %v269_v45, %v194_v33  ;;  %v273_v48 = vadd.f32 %v272_v46, %v199_v37 }
 0x13e   :  { %498 = vtanh.f32 %v270_v47 }
 0x13f   :  { %500 = vtanh.f32 %v273_v48 }
 0x142   :  { %v278_v52 = vpop.f32.mrf.mxu2  ;;  %v284_v53 = vpop.f32.mrf.mxu3 }
 0x143   :  { %v275_v54 = vpop.f32.mrf.mxu1  ;;  %v279_v57 = vadd.f32 %v278_v52, %v209_v35  ;;  %v285_v60 = vadd.f32 %v284_v53, %v219_v36 }
 0x144   :  { %v276_v55 = vadd.f32 %v275_v54, %v204_v34  ;;  %v499_v56 = vpop.eup %498 }
 0x145   :  { %v501_v58 = vpop.eup %500  ;;  %v339_v61 = vmul.f32 %v499_v56, %v307_v44  ;;  %v387_v1 = vmul.f32 %v499_v56, %v361_v42 }
 0x146   :  { %502 = vtanh.f32 %v276_v55  ;;  %v340_v62 = vmul.f32 %v501_v58, %v312_v39  ;;  %v388_v2 = vmul.f32 %v501_v58, %v365_v43 }
 0x147   :  { %504 = vtanh.f32 %v279_v57 }
 0x148   :  { %506 = vtanh.f32 %v285_v60  ;;  %v346_v10 = vadd.f32 %v340_v62, %v339_v61  ;;  %v394_v11 = vadd.f32 %v388_v2, %v387_v1 }
 0x14a   :  { %v281_v5 = vpop.f32.mrf.mxu2  ;;  %v287_v6 = vpop.f32.mrf.mxu3 }
 0x14b   :  { %v282_v7 = vadd.f32 %v281_v5, %v214_v40  ;;  %v288_v8 = vadd.f32 %v287_v6, %v224_v38 }
 0x14c   :  { %v503_v9 = vpop.eup %502 }
 0x14d   :  { %508 = vtanh.f32 %v282_v7  ;;  %v341_v12 = vmul.f32 %v503_v9, %v317_v41  ;;  %v389_v13 = vmul.f32 %v503_v9, %v369_v63  ;;  %v505_v14 = vpop.eup %504 }
 0x14e   :  { %510 = vtanh.f32 %v288_v8  ;;  %v507_v17 = vpop.eup %506  ;;  %v342_v18 = vmul.f32 %v505_v14, %v322_v51  ;;  %v390_v19 = vmul.f32 %v505_v14, %v373_v49  ;;  %v413_v49 = vpop.permute.xlu0 %412 }
 0x14f   :  { %v347_v15 = vadd.f32 %v346_v10, %v341_v12  ;;  %v395_v16 = vadd.f32 %v394_v11, %v389_v13  ;;  %v344_v3 = vmul.f32 %v507_v17, %v332_v0  ;;  %v392_v30 = vmul.f32 %v507_v17, %v381_v23 }
 0x151   :  { %v396_v27 = vadd.f32 %v395_v16, %v390_v19  ;;  %v348_v28 = vadd.f32 %v347_v15, %v342_v18 }
 0x153   :  { %v509_v22 = vpop.eup %508 }
 0x154   :  { %v511_v24 = vpop.eup %510  ;;  %v343_v25 = vmul.f32 %v509_v22, %v327_v50  ;;  %v391_v26 = vmul.f32 %v509_v22, %v377_v59 }
 0x155   :  { %v393_v29 = vmul.f32 %v511_v24, %v385_v20  ;;  %v345_v4 = vmul.f32 %v511_v24, %v337_v21 }
 0x156   :  { %v397_v31 = vadd.f32 %v396_v27, %v391_v26  ;;  %v349_v32 = vadd.f32 %v348_v28, %v343_v25 }
 0x157   :  { %v399_v35 = vsel %vm248_vm0, %v393_v29, 0.0  ;;  %v351_v36 = vsel %vm248_vm0, %v345_v4, 0.0 }
 0x158   :  { %v398_v33 = vadd.f32 %v397_v31, %v392_v30  ;;  %v350_v34 = vadd.f32 %v349_v32, %v344_v3 }
 0x15a   :  { %v400_v37 = vadd.f32 %v399_v35, %v398_v33  ;;  %v352_v38 = vadd.f32 %v351_v36, %v350_v34 }
 0x15c   :  { %v401_v39 = vrot.slane %v400_v37, 4  ;;  %v353_v40 = vrot.slane %v352_v38, 4 }
 0x15e   :  { %v402_v41 = vadd.f32 %v401_v39, %v400_v37  ;;  %v354_v42 = vadd.f32 %v353_v40, %v352_v38 }
 0x160   :  { %v403_v43 = vrot.slane %v402_v41, 2  ;;  %v355_v44 = vrot.slane %v354_v42, 2 }
 0x162   :  { %v404_v45 = vadd.f32 %v403_v43, %v402_v41  ;;  %v356_v46 = vadd.f32 %v355_v44, %v354_v42 }
 0x164   :  { %v357_v47 = vrot.slane %v356_v46, 1  ;;  %v405_v48 = vrot.slane %v404_v45, 1 }
 0x166   :  { %v358_v50 = vadd.f32 %v357_v47, %v356_v46  ;;  %v406_v51 = vadd.f32 %v405_v48, %v404_v45 }
 0x168   :  { %v408_v52 = vsel %vm407_vm2, %v358_v50, %v406_v51 }
 0x169   :  { %v415_v53 = vadd.f32 %v413_v49, %v408_v52 }
 0x16b   :  { %416 = vst [vmem:[#allocation2] sm:$0x3] %v415_v53 }
 0x16c   :  { %427 = dma.vmem_to_hbm [thread:$0]  %s423_s20, 32, %s425_s23, [#allocation3]  }
 0x16d   :  { %536 = dma.done.wait [#allocation3], 32  }
 0x16e   :  { %537 = vsyncadd [#allocation3], 4294967264 }
 0x16f   :  { %432 = vsyncpa [#allocation3], 1 }

</bundles_post_ra>
